<compile_context>
chip_gen: v7x
topology: tpu7x:2x2x1
jax: 0.10.0
libtpu: 0.0.40
codegen_flags: <defaults>
</compile_context>

<pallas_src>
import jax
import jax.numpy as jnp
from jax.experimental import pallas as pl
from jax.experimental.pallas import tpu as pltpu


_VMEM_LIMIT = 32 * 1024 * 1024  # explicit scoped-VMEM limit, safe on v5e/v6e/v7x


def _round_up(n, m):
    return ((n + m - 1) // m) * m


def _pad_axis_to(a, axis, target):
    pad = target - a.shape[axis]
    if pad <= 0:
        return a
    widths = [(0, 0)] * a.ndim
    widths[axis] = (0, pad)
    return jnp.pad(a, widths)


# ---------------------------------------------------------------------------
# Pallas kernels
# ---------------------------------------------------------------------------

def _conv_relu_pool_kernel(p_ref, w_ref, b_ref, o_ref):
    """Fused valid-conv (transposed GEMM) + bias + ReLU + 2x2 max-pool.

    p_ref: (4, Kp, tm)  bf16  im2col patches^T, one slab per pool-window pos
    w_ref: (O,  Kp)     bf16  conv weights, K zero-padded to Kp (16-multiple)
    b_ref: (O,  128)    f32   lane-broadcast bias
    o_ref: (O,  tm)     bf16  pooled activation tile (lane-dense M axis)
    """
    w = w_ref[...]
    y0 = jnp.dot(w, p_ref[0], preferred_element_type=jnp.float32)
    y1 = jnp.dot(w, p_ref[1], preferred_element_type=jnp.float32)
    y2 = jnp.dot(w, p_ref[2], preferred_element_type=jnp.float32)
    y3 = jnp.dot(w, p_ref[3], preferred_element_type=jnp.float32)
    y = jnp.maximum(jnp.maximum(y0, y1), jnp.maximum(y2, y3))
    b = b_ref[...][:, :1]                       # (O, 1), broadcasts over lanes
    o_ref[...] = jnp.maximum(y + b, 0.0).astype(o_ref.dtype)


def _fused_mlp_kernel(x_ref, w1_ref, b1_ref, w2_ref, b2_ref, w3_ref, b3_ref,
                      o_ref):
    """fc1+ReLU -> fc2+ReLU -> fc3 chained in one launch, weights VMEM-resident.

    x_ref: (tm, Kp) bf16; w*: bf16 (zero-padded to 128 multiples); b*: f32.
    Accumulation / bias / ReLU in f32, cast back to bf16 between MXU calls.
    """
    h = jnp.dot(x_ref[...], w1_ref[...], preferred_element_type=jnp.float32)
    h = jnp.maximum(h + b1_ref[...], 0.0)
    h = jnp.dot(h.astype(jnp.bfloat16), w2_ref[...],
                preferred_element_type=jnp.float32)
    h = jnp.maximum(h + b2_ref[...], 0.0)
    h = jnp.dot(h.astype(jnp.bfloat16), w3_ref[...],
                preferred_element_type=jnp.float32)
    o_ref[...] = (h + b3_ref[...]).astype(o_ref.dtype)


# ---------------------------------------------------------------------------
# Glue: pool-fused im2col (transposed), CNHW in — layout plumbing only
# ---------------------------------------------------------------------------

def _pooled_patches_T(x_cnhw, k):
    """x:(C,B,H,W) -> (4, C*k*k, B*Ho2*Wo2): im2col^T per 2x2 pool-window pos.

    K index = c*k*k + i*k + j (matches PyTorch weight.reshape(O, C*k*k)).
    M index = b*Ho2*Wo2 + ho2*Wo2 + wo2.
    """
    C, B, H, W = x_cnhw.shape
    Ho, Wo = H - k + 1, W - k + 1
    Ho2, Wo2 = Ho // 2, Wo // 2
    shifts = [x_cnhw[:, :, i:i + Ho, j:j + Wo]
              for i in range(k) for j in range(k)]
    p = jnp.stack(shifts, axis=1)                        # (C, kk, B, Ho, Wo)
    p = p[:, :, :, :2 * Ho2, :2 * Wo2]
    p = p.reshape(C, k * k, B, Ho2, 2, Wo2, 2)
    p = p.transpose(4, 6, 0, 1, 2, 3, 5)                 # (di,dj,C,kk,B,Ho2,Wo2)
    return p.reshape(4, C * k * k, B * Ho2 * Wo2)


# ---------------------------------------------------------------------------
# Pallas wrappers
# ---------------------------------------------------------------------------

def conv5x5_relu_pool(x_cnhw, w, b, *, tm_max=2048):
    """max_pool2x2(ReLU(conv2d_valid(x, w) + b)).

    Input  x_cnhw: (C, B, H, W) bf16.
    Output:        (O, B, Ho2, Wo2) bf16 — directly the layout the next stage
    consumes (no NCHW transpose, half the writeback bytes).
    """
    C, B, H, W = x_cnhw.shape
    O, _, k, _ = w.shape
    K = C * k * k
    Ho2, Wo2 = (H - k + 1) // 2, (W - k + 1) // 2
    M = B * Ho2 * Wo2

    Kp = _round_up(K, 16)                 # bf16 sublane tile: 75->80, 150->160
    # >=2 grid steps when M allows (keeps both v7x TensorCores busy), while
    # large batches still get big lane-dense tiles for v5e/v6e DMA efficiency.
    tm = min(tm_max, max(128, _round_up((M + 1) // 2, 128)))
    Mp = _round_up(M, tm)

    p = _pooled_patches_T(x_cnhw, k)                                # (4, K, M) bf16
    p = _pad_axis_to(_pad_axis_to(p, 1, Kp), 2, Mp)
    w2 = _pad_axis_to(w.reshape(O, K), 1, Kp).astype(jnp.bfloat16)  # (O, Kp)
    b2 = jnp.broadcast_to(b.astype(jnp.float32).reshape(O, 1), (O, 128))

    cost = pl.CostEstimate(
        flops=2 * O * Kp * Mp * 4,
        transcendentals=0,
        bytes_accessed=p.size * 2 + w2.size * 2 + b2.size * 4 + O * Mp * 2)

    out = pl.pallas_call(
        _conv_relu_pool_kernel,
        out_shape=jax.ShapeDtypeStruct((O, Mp), jnp.bfloat16),
        grid=(Mp // tm,),
        in_specs=[
            pl.BlockSpec((4, Kp, tm), lambda m: (0, 0, m)),
            pl.BlockSpec((O, Kp), lambda m: (0, 0)),
            pl.BlockSpec((O, 128), lambda m: (0, 0)),
        ],
        out_specs=pl.BlockSpec((O, tm), lambda m: (0, m)),
        compiler_params=pltpu.CompilerParams(
            dimension_semantics=("parallel",),
            vmem_limit_bytes=_VMEM_LIMIT),
        cost_estimate=cost,
    )(p, w2, b2)

    # Padded-M columns hold relu(bias) garbage; slice them off before reshape.
    return out[:, :M].reshape(O, B, Ho2, Wo2)


def fused_mlp(x, fc1, fc2, fc3, *, tm_max=256):
    """relu(fc1) -> relu(fc2) -> fc3 in a single Pallas call. x: (B, F) bf16."""
    (w1, b1), (w2, b2), (w3, b3) = fc1, fc2, fc3
    B, F = x.shape
    Kp = _round_up(F, 128)            # 400 -> 512
    H1 = _round_up(w1.shape[1], 128)  # 120 -> 128
    H2 = _round_up(w2.shape[1], 128)  # 84  -> 128
    Np = _round_up(w3.shape[1], 128)  # 10  -> 128
    # >=2 grid steps when the batch allows (v7x), tiny batches stay single-step.
    tm = min(tm_max, max(8, _round_up((B + 1) // 2, 8)))
    Bp = _round_up(B, tm)

    xp = _pad_axis_to(_pad_axis_to(x, 0, Bp), 1, Kp).astype(jnp.bfloat16)
    w1p = _pad_axis_to(_pad_axis_to(w1, 0, Kp), 1, H1).astype(jnp.bfloat16)
    w2p = _pad_axis_to(_pad_axis_to(w2, 0, H1), 1, H2).astype(jnp.bfloat16)
    w3p = _pad_axis_to(_pad_axis_to(w3, 0, H2), 1, Np).astype(jnp.bfloat16)
    b1p = _pad_axis_to(b1.reshape(1, -1), 1, H1).astype(jnp.float32)
    b2p = _pad_axis_to(b2.reshape(1, -1), 1, H2).astype(jnp.float32)
    b3p = _pad_axis_to(b3.reshape(1, -1), 1, Np).astype(jnp.float32)

    out = pl.pallas_call(
        _fused_mlp_kernel,
        out_shape=jax.ShapeDtypeStruct((Bp, Np), jnp.float32),
        grid=(Bp // tm,),
        in_specs=[
            pl.BlockSpec((tm, Kp), lambda m: (m, 0)),
            pl.BlockSpec((Kp, H1), lambda m: (0, 0)),
            pl.BlockSpec((1, H1), lambda m: (0, 0)),
            pl.BlockSpec((H1, H2), lambda m: (0, 0)),
            pl.BlockSpec((1, H2), lambda m: (0, 0)),
            pl.BlockSpec((H2, Np), lambda m: (0, 0)),
            pl.BlockSpec((1, Np), lambda m: (0, 0)),
        ],
        out_specs=pl.BlockSpec((tm, Np), lambda m: (m, 0)),
        compiler_params=pltpu.CompilerParams(
            dimension_semantics=("parallel",),
            vmem_limit_bytes=_VMEM_LIMIT),
    )(xp, w1p, b1p, w2p, b2p, w3p, b3p)
    return out[:B, :w3.shape[1]]


# ---------------------------------------------------------------------------
# Parameter init (deterministic, PyTorch-style uniform(-1/sqrt(fan_in), ...))
# ---------------------------------------------------------------------------

def init_params(key):
    def uconv(key, o, c, k):
        kw, kb = jax.random.split(key)
        bound = 1.0 / jnp.sqrt(c * k * k)
        w = jax.random.uniform(kw, (o, c, k, k), jnp.float32, -bound, bound)
        b = jax.random.uniform(kb, (o,), jnp.float32, -bound, bound)
        return w, b

    def ulin(key, in_f, out_f):
        kw, kb = jax.random.split(key)
        bound = 1.0 / jnp.sqrt(in_f)
        w = jax.random.uniform(kw, (in_f, out_f), jnp.float32, -bound, bound)
        b = jax.random.uniform(kb, (out_f,), jnp.float32, -bound, bound)
        return w, b

    k1, k2, k3, k4, k5 = jax.random.split(key, 5)
    return {
        "cv1": uconv(k1, 6, 3, 5),
        "cv2": uconv(k2, 16, 6, 5),
        "fc1": ulin(k3, 16 * 5 * 5, 120),
        "fc2": ulin(k4, 120, 84),
        "fc3": ulin(k5, 84, 10),
    }


# ---------------------------------------------------------------------------
# Forward pass (mirrors CustomNet.forward)
# ---------------------------------------------------------------------------

@jax.jit
def customnet_forward(params, x):
    # x: (B, 3, 32, 32) NCHW float32.  Cast to bf16 BEFORE any glue and work
    # in (C, B, H, W) between the two conv stages (no per-stage transposes).
    x = jnp.transpose(x.astype(jnp.bfloat16), (1, 0, 2, 3))       # (3, B, 32, 32)
    x = conv5x5_relu_pool(x, *params["cv1"])                      # (6, B, 14, 14)
    x = conv5x5_relu_pool(x, *params["cv2"])                      # (16, B, 5, 5)
    B = x.shape[1]
    # Tiny (B*400) transpose back to NCHW-flatten order for .view(-1, 400).
    x = jnp.transpose(x, (1, 0, 2, 3)).reshape(B, 16 * 5 * 5)
    return fused_mlp(x, params["fc1"], params["fc2"], params["fc3"])  # (B, 10)


if __name__ == "__main__":
    key = jax.random.PRNGKey(0)
    kp, kx = jax.random.split(key)
    params = init_params(kp)
    # LeNet geometry requires 3x32x32 input (flatten = 16*5*5 = 400).
    x = jax.random.normal(kx, (2, 3, 32, 32), jnp.float32)

    out = customnet_forward(params, x)
    out = jax.block_until_ready(out)
    assert out.shape == (2, 10), out.shape
    assert bool(jnp.all(jnp.isfinite(out)))
    print("KERNEL_OK")
</pallas_src>

<mosaic_0001>
module attributes {stable_mosaic.version = 11 : i64} {
  func.func @_conv_relu_pool_kernel(%arg0: i32, %arg1: memref<4x80x256xbf16, #tpu.memory_space<vmem>>, %arg2: memref<6x80xbf16, #tpu.memory_space<vmem>>, %arg3: memref<6x128xf32, #tpu.memory_space<vmem>>, %arg4: memref<6x256xbf16, #tpu.memory_space<vmem>>) attributes {dimension_semantics = [#tpu.dimension_semantics<parallel>], iteration_bounds = array<i64: 2>, scalar_prefetch = 0 : i64, scratch_operands = 0 : i64, tpu.core_type = #tpu.core_type<tc>, window_params = [{transform_indices = @transform_0, window_bounds = array<i64: 4, 80, 256>}, {pipeline_mode = #tpu.pipeline_mode<synchronous>, transform_indices = @transform_1, window_bounds = array<i64: 6, 80>}, {pipeline_mode = #tpu.pipeline_mode<synchronous>, transform_indices = @transform_2, window_bounds = array<i64: 6, 128>}, {transform_indices = @transform_3, window_bounds = array<i64: 6, 256>}]} {
    %c0 = arith.constant 0 : index
    %c0_0 = arith.constant 0 : index
    %0 = vector.load %arg2[%c0, %c0_0] : memref<6x80xbf16, #tpu.memory_space<vmem>>, vector<6x80xbf16>
    %c0_1 = arith.constant 0 : index
    %c0_2 = arith.constant 0 : index
    %c0_3 = arith.constant 0 : index
    %1 = vector.load %arg1[%c0_1, %c0_2, %c0_3] : memref<4x80x256xbf16, #tpu.memory_space<vmem>>, vector<1x80x256xbf16>
    %2 = vector.shape_cast %1 : vector<1x80x256xbf16> to vector<80x256xbf16>
    %cst = arith.constant dense<0.000000e+00> : vector<6x256xf32>
    %3 = tpu.matmul %0, %2, %cst {dimension_numbers = #tpu.dot_dimension_numbers<[1], [0], [0], [1], [0, 0, 1, 1], [], []>} : vector<6x80xbf16>, vector<80x256xbf16>, vector<6x256xf32> -> vector<6x256xf32>
    %c1 = arith.constant 1 : index
    %c0_4 = arith.constant 0 : index
    %c0_5 = arith.constant 0 : index
    %4 = vector.load %arg1[%c1, %c0_4, %c0_5] : memref<4x80x256xbf16, #tpu.memory_space<vmem>>, vector<1x80x256xbf16>
    %5 = vector.shape_cast %4 : vector<1x80x256xbf16> to vector<80x256xbf16>
    %cst_6 = arith.constant dense<0.000000e+00> : vector<6x256xf32>
    %6 = tpu.matmul %0, %5, %cst_6 {dimension_numbers = #tpu.dot_dimension_numbers<[1], [0], [0], [1], [0, 0, 1, 1], [], []>} : vector<6x80xbf16>, vector<80x256xbf16>, vector<6x256xf32> -> vector<6x256xf32>
    %c2 = arith.constant 2 : index
    %c0_7 = arith.constant 0 : index
    %c0_8 = arith.constant 0 : index
    %7 = vector.load %arg1[%c2, %c0_7, %c0_8] : memref<4x80x256xbf16, #tpu.memory_space<vmem>>, vector<1x80x256xbf16>
    %8 = vector.shape_cast %7 : vector<1x80x256xbf16> to vector<80x256xbf16>
    %cst_9 = arith.constant dense<0.000000e+00> : vector<6x256xf32>
    %9 = tpu.matmul %0, %8, %cst_9 {dimension_numbers = #tpu.dot_dimension_numbers<[1], [0], [0], [1], [0, 0, 1, 1], [], []>} : vector<6x80xbf16>, vector<80x256xbf16>, vector<6x256xf32> -> vector<6x256xf32>
    %c3 = arith.constant 3 : index
    %c0_10 = arith.constant 0 : index
    %c0_11 = arith.constant 0 : index
    %10 = vector.load %arg1[%c3, %c0_10, %c0_11] : memref<4x80x256xbf16, #tpu.memory_space<vmem>>, vector<1x80x256xbf16>
    %11 = vector.shape_cast %10 : vector<1x80x256xbf16> to vector<80x256xbf16>
    %cst_12 = arith.constant dense<0.000000e+00> : vector<6x256xf32>
    %12 = tpu.matmul %0, %11, %cst_12 {dimension_numbers = #tpu.dot_dimension_numbers<[1], [0], [0], [1], [0, 0, 1, 1], [], []>} : vector<6x80xbf16>, vector<80x256xbf16>, vector<6x256xf32> -> vector<6x256xf32>
    %13 = arith.maximumf %3, %6 : vector<6x256xf32>
    %14 = arith.maximumf %9, %12 : vector<6x256xf32>
    %15 = arith.maximumf %13, %14 : vector<6x256xf32>
    %c0_13 = arith.constant 0 : index
    %c0_14 = arith.constant 0 : index
    %16 = vector.load %arg3[%c0_13, %c0_14] : memref<6x128xf32, #tpu.memory_space<vmem>>, vector<6x128xf32>
    %17 = vector.extract_strided_slice %16 {offsets = [0, 0], sizes = [6, 1], strides = [1, 1]} : vector<6x128xf32> to vector<6x1xf32>
    %18 = vector.broadcast %17 : vector<6x1xf32> to vector<6x256xf32>
    %19 = arith.addf %15, %18 : vector<6x256xf32>
    %cst_15 = arith.constant 0.000000e+00 : f32
    %20 = vector.broadcast %cst_15 : f32 to vector<6x256xf32>
    %21 = arith.maximumf %19, %20 : vector<6x256xf32>
    %22 = arith.truncf %21 : vector<6x256xf32> to vector<6x256xbf16>
    %c0_16 = arith.constant 0 : index
    %c0_17 = arith.constant 0 : index
    %23 = vector.load %arg4[%c0_16, %c0_17] : memref<6x256xbf16, #tpu.memory_space<vmem>>, vector<6x256xbf16>
    tpu.vector_store %arg4[%c0_16, %c0_17], %22 {strides = array<i32>} : memref<6x256xbf16, #tpu.memory_space<vmem>>, vector<6x256xbf16>,
    return
  }
  func.func @transform_0(%arg0: i32) -> (i32, i32, i32) {
    %c0_i32 = arith.constant 0 : i32
    %c0_i32_0 = arith.constant 0 : i32
    %c0_i32_1 = arith.constant 0 : i32
    return %c0_i32, %c0_i32_0, %arg0 : i32, i32, i32
  }
  func.func @transform_1(%arg0: i32) -> (i32, i32) {
    %c0_i32 = arith.constant 0 : i32
    %c0_i32_0 = arith.constant 0 : i32
    %c0_i32_1 = arith.constant 0 : i32
    return %c0_i32, %c0_i32_0 : i32, i32
  }
  func.func @transform_2(%arg0: i32) -> (i32, i32) {
    %c0_i32 = arith.constant 0 : i32
    %c0_i32_0 = arith.constant 0 : i32
    %c0_i32_1 = arith.constant 0 : i32
    return %c0_i32, %c0_i32_0 : i32, i32
  }
  func.func @transform_3(%arg0: i32) -> (i32, i32) {
    %c0_i32 = arith.constant 0 : i32
    %c0_i32_0 = arith.constant 0 : i32
    return %c0_i32, %arg0 : i32, i32
  }
}

module attributes {stable_mosaic.version = 11 : i64} {
  func.func @_conv_relu_pool_kernel(%arg0: i32, %arg1: memref<4x160x128xbf16, #tpu.memory_space<vmem>>, %arg2: memref<16x160xbf16, #tpu.memory_space<vmem>>, %arg3: memref<16x128xf32, #tpu.memory_space<vmem>>, %arg4: memref<16x128xbf16, #tpu.memory_space<vmem>>) attributes {dimension_semantics = [#tpu.dimension_semantics<parallel>], iteration_bounds = array<i64: 1>, scalar_prefetch = 0 : i64, scratch_operands = 0 : i64, tpu.core_type = #tpu.core_type<tc>, window_params = [{transform_indices = @transform_0, window_bounds = array<i64: 4, 160, 128>}, {pipeline_mode = #tpu.pipeline_mode<synchronous>, transform_indices = @transform_1, window_bounds = array<i64: 16, 160>}, {pipeline_mode = #tpu.pipeline_mode<synchronous>, transform_indices = @transform_2, window_bounds = array<i64: 16, 128>}, {transform_indices = @transform_3, window_bounds = array<i64: 16, 128>}]} {
    %c0 = arith.constant 0 : index
    %c0_0 = arith.constant 0 : index
    %0 = vector.load %arg2[%c0, %c0_0] : memref<16x160xbf16, #tpu.memory_space<vmem>>, vector<16x160xbf16>
    %c0_1 = arith.constant 0 : index
    %c0_2 = arith.constant 0 : index
    %c0_3 = arith.constant 0 : index
    %1 = vector.load %arg1[%c0_1, %c0_2, %c0_3] : memref<4x160x128xbf16, #tpu.memory_space<vmem>>, vector<1x160x128xbf16>
    %2 = vector.shape_cast %1 : vector<1x160x128xbf16> to vector<160x128xbf16>
    %cst = arith.constant dense<0.000000e+00> : vector<16x128xf32>
    %3 = tpu.matmul %0, %2, %cst {dimension_numbers = #tpu.dot_dimension_numbers<[1], [0], [0], [1], [0, 0, 1, 1], [], []>} : vector<16x160xbf16>, vector<160x128xbf16>, vector<16x128xf32> -> vector<16x128xf32>
    %c1 = arith.constant 1 : index
    %c0_4 = arith.constant 0 : index
    %c0_5 = arith.constant 0 : index
    %4 = vector.load %arg1[%c1, %c0_4, %c0_5] : memref<4x160x128xbf16, #tpu.memory_space<vmem>>, vector<1x160x128xbf16>
    %5 = vector.shape_cast %4 : vector<1x160x128xbf16> to vector<160x128xbf16>
    %cst_6 = arith.constant dense<0.000000e+00> : vector<16x128xf32>
    %6 = tpu.matmul %0, %5, %cst_6 {dimension_numbers = #tpu.dot_dimension_numbers<[1], [0], [0], [1], [0, 0, 1, 1], [], []>} : vector<16x160xbf16>, vector<160x128xbf16>, vector<16x128xf32> -> vector<16x128xf32>
    %c2 = arith.constant 2 : index
    %c0_7 = arith.constant 0 : index
    %c0_8 = arith.constant 0 : index
    %7 = vector.load %arg1[%c2, %c0_7, %c0_8] : memref<4x160x128xbf16, #tpu.memory_space<vmem>>, vector<1x160x128xbf16>
    %8 = vector.shape_cast %7 : vector<1x160x128xbf16> to vector<160x128xbf16>
    %cst_9 = arith.constant dense<0.000000e+00> : vector<16x128xf32>
    %9 = tpu.matmul %0, %8, %cst_9 {dimension_numbers = #tpu.dot_dimension_numbers<[1], [0], [0], [1], [0, 0, 1, 1], [], []>} : vector<16x160xbf16>, vector<160x128xbf16>, vector<16x128xf32> -> vector<16x128xf32>
    %c3 = arith.constant 3 : index
    %c0_10 = arith.constant 0 : index
    %c0_11 = arith.constant 0 : index
    %10 = vector.load %arg1[%c3, %c0_10, %c0_11] : memref<4x160x128xbf16, #tpu.memory_space<vmem>>, vector<1x160x128xbf16>
    %11 = vector.shape_cast %10 : vector<1x160x128xbf16> to vector<160x128xbf16>
    %cst_12 = arith.constant dense<0.000000e+00> : vector<16x128xf32>
    %12 = tpu.matmul %0, %11, %cst_12 {dimension_numbers = #tpu.dot_dimension_numbers<[1], [0], [0], [1], [0, 0, 1, 1], [], []>} : vector<16x160xbf16>, vector<160x128xbf16>, vector<16x128xf32> -> vector<16x128xf32>
    %13 = arith.maximumf %3, %6 : vector<16x128xf32>
    %14 = arith.maximumf %9, %12 : vector<16x128xf32>
    %15 = arith.maximumf %13, %14 : vector<16x128xf32>
    %c0_13 = arith.constant 0 : index
    %c0_14 = arith.constant 0 : index
    %16 = vector.load %arg3[%c0_13, %c0_14] : memref<16x128xf32, #tpu.memory_space<vmem>>, vector<16x128xf32>
    %17 = vector.extract_strided_slice %16 {offsets = [0, 0], sizes = [16, 1], strides = [1, 1]} : vector<16x128xf32> to vector<16x1xf32>
    %18 = vector.broadcast %17 : vector<16x1xf32> to vector<16x128xf32>
    %19 = arith.addf %15, %18 : vector<16x128xf32>
    %cst_15 = arith.constant 0.000000e+00 : f32
    %20 = vector.broadcast %cst_15 : f32 to vector<16x128xf32>
    %21 = arith.maximumf %19, %20 : vector<16x128xf32>
    %22 = arith.truncf %21 : vector<16x128xf32> to vector<16x128xbf16>
    %c0_16 = arith.constant 0 : index
    %c0_17 = arith.constant 0 : index
    %23 = vector.load %arg4[%c0_16, %c0_17] : memref<16x128xbf16, #tpu.memory_space<vmem>>, vector<16x128xbf16>
    tpu.vector_store %arg4[%c0_16, %c0_17], %22 {strides = array<i32>} : memref<16x128xbf16, #tpu.memory_space<vmem>>, vector<16x128xbf16>,
    return
  }
  func.func @transform_0(%arg0: i32) -> (i32, i32, i32) {
    %c0_i32 = arith.constant 0 : i32
    %c0_i32_0 = arith.constant 0 : i32
    %c0_i32_1 = arith.constant 0 : i32
    return %c0_i32, %c0_i32_0, %arg0 : i32, i32, i32
  }
  func.func @transform_1(%arg0: i32) -> (i32, i32) {
    %c0_i32 = arith.constant 0 : i32
    %c0_i32_0 = arith.constant 0 : i32
    %c0_i32_1 = arith.constant 0 : i32
    return %c0_i32, %c0_i32_0 : i32, i32
  }
  func.func @transform_2(%arg0: i32) -> (i32, i32) {
    %c0_i32 = arith.constant 0 : i32
    %c0_i32_0 = arith.constant 0 : i32
    %c0_i32_1 = arith.constant 0 : i32
    return %c0_i32, %c0_i32_0 : i32, i32
  }
  func.func @transform_3(%arg0: i32) -> (i32, i32) {
    %c0_i32 = arith.constant 0 : i32
    %c0_i32_0 = arith.constant 0 : i32
    return %c0_i32, %arg0 : i32, i32
  }
}

module attributes {stable_mosaic.version = 11 : i64} {
  func.func @_fused_mlp_kernel(%arg0: i32, %arg1: memref<8x512xbf16, #tpu.memory_space<vmem>>, %arg2: memref<512x128xbf16, #tpu.memory_space<vmem>>, %arg3: memref<1x128xf32, #tpu.memory_space<vmem>>, %arg4: memref<128x128xbf16, #tpu.memory_space<vmem>>, %arg5: memref<1x128xf32, #tpu.memory_space<vmem>>, %arg6: memref<128x128xbf16, #tpu.memory_space<vmem>>, %arg7: memref<1x128xf32, #tpu.memory_space<vmem>>, %arg8: memref<8x128xf32, #tpu.memory_space<vmem>>) attributes {dimension_semantics = [#tpu.dimension_semantics<parallel>], iteration_bounds = array<i64: 1>, scalar_prefetch = 0 : i64, scratch_operands = 0 : i64, tpu.core_type = #tpu.core_type<tc>, window_params = [{transform_indices = @transform_0, window_bounds = array<i64: 8, 512>}, {pipeline_mode = #tpu.pipeline_mode<synchronous>, transform_indices = @transform_1, window_bounds = array<i64: 512, 128>}, {pipeline_mode = #tpu.pipeline_mode<synchronous>, transform_indices = @transform_2, window_bounds = array<i64: 1, 128>}, {pipeline_mode = #tpu.pipeline_mode<synchronous>, transform_indices = @transform_3, window_bounds = array<i64: 128, 128>}, {pipeline_mode = #tpu.pipeline_mode<synchronous>, transform_indices = @transform_4, window_bounds = array<i64: 1, 128>}, {pipeline_mode = #tpu.pipeline_mode<synchronous>, transform_indices = @transform_5, window_bounds = array<i64: 128, 128>}, {pipeline_mode = #tpu.pipeline_mode<synchronous>, transform_indices = @transform_6, window_bounds = array<i64: 1, 128>}, {transform_indices = @transform_7, window_bounds = array<i64: 8, 128>}]} {
    %c0 = arith.constant 0 : index
    %c0_0 = arith.constant 0 : index
    %0 = vector.load %arg1[%c0, %c0_0] : memref<8x512xbf16, #tpu.memory_space<vmem>>, vector<8x512xbf16>
    %c0_1 = arith.constant 0 : index
    %c0_2 = arith.constant 0 : index
    %1 = vector.load %arg2[%c0_1, %c0_2] : memref<512x128xbf16, #tpu.memory_space<vmem>>, vector<512x128xbf16>
    %cst = arith.constant dense<0.000000e+00> : vector<8x128xf32>
    %2 = tpu.matmul %0, %1, %cst {dimension_numbers = #tpu.dot_dimension_numbers<[1], [0], [0], [1], [0, 0, 1, 1], [], []>} : vector<8x512xbf16>, vector<512x128xbf16>, vector<8x128xf32> -> vector<8x128xf32>
    %c0_3 = arith.constant 0 : index
    %c0_4 = arith.constant 0 : index
    %3 = vector.load %arg3[%c0_3, %c0_4] : memref<1x128xf32, #tpu.memory_space<vmem>>, vector<1x128xf32>
    %4 = vector.broadcast %3 : vector<1x128xf32> to vector<8x128xf32>
    %5 = arith.addf %2, %4 : vector<8x128xf32>
    %cst_5 = arith.constant 0.000000e+00 : f32
    %6 = vector.broadcast %cst_5 : f32 to vector<8x128xf32>
    %7 = arith.maximumf %5, %6 : vector<8x128xf32>
    %8 = arith.truncf %7 : vector<8x128xf32> to vector<8x128xbf16>
    %c0_6 = arith.constant 0 : index
    %c0_7 = arith.constant 0 : index
    %9 = vector.load %arg4[%c0_6, %c0_7] : memref<128x128xbf16, #tpu.memory_space<vmem>>, vector<128x128xbf16>
    %cst_8 = arith.constant dense<0.000000e+00> : vector<8x128xf32>
    %10 = tpu.matmul %8, %9, %cst_8 {dimension_numbers = #tpu.dot_dimension_numbers<[1], [0], [0], [1], [0, 0, 1, 1], [], []>} : vector<8x128xbf16>, vector<128x128xbf16>, vector<8x128xf32> -> vector<8x128xf32>
    %c0_9 = arith.constant 0 : index
    %c0_10 = arith.constant 0 : index
    %11 = vector.load %arg5[%c0_9, %c0_10] : memref<1x128xf32, #tpu.memory_space<vmem>>, vector<1x128xf32>
    %12 = vector.broadcast %11 : vector<1x128xf32> to vector<8x128xf32>
    %13 = arith.addf %10, %12 : vector<8x128xf32>
    %cst_11 = arith.constant 0.000000e+00 : f32
    %14 = vector.broadcast %cst_11 : f32 to vector<8x128xf32>
    %15 = arith.maximumf %13, %14 : vector<8x128xf32>
    %16 = arith.truncf %15 : vector<8x128xf32> to vector<8x128xbf16>
    %c0_12 = arith.constant 0 : index
    %c0_13 = arith.constant 0 : index
    %17 = vector.load %arg6[%c0_12, %c0_13] : memref<128x128xbf16, #tpu.memory_space<vmem>>, vector<128x128xbf16>
    %cst_14 = arith.constant dense<0.000000e+00> : vector<8x128xf32>
    %18 = tpu.matmul %16, %17, %cst_14 {dimension_numbers = #tpu.dot_dimension_numbers<[1], [0], [0], [1], [0, 0, 1, 1], [], []>} : vector<8x128xbf16>, vector<128x128xbf16>, vector<8x128xf32> -> vector<8x128xf32>
    %c0_15 = arith.constant 0 : index
    %c0_16 = arith.constant 0 : index
    %19 = vector.load %arg7[%c0_15, %c0_16] : memref<1x128xf32, #tpu.memory_space<vmem>>, vector<1x128xf32>
    %20 = vector.broadcast %19 : vector<1x128xf32> to vector<8x128xf32>
    %21 = arith.addf %18, %20 : vector<8x128xf32>
    %c0_17 = arith.constant 0 : index
    %c0_18 = arith.constant 0 : index
    %22 = vector.load %arg8[%c0_17, %c0_18] : memref<8x128xf32, #tpu.memory_space<vmem>>, vector<8x128xf32>
    tpu.vector_store %arg8[%c0_17, %c0_18], %21 {strides = array<i32>} : memref<8x128xf32, #tpu.memory_space<vmem>>, vector<8x128xf32>,
    return
  }
  func.func @transform_0(%arg0: i32) -> (i32, i32) {
    %c0_i32 = arith.constant 0 : i32
    %c0_i32_0 = arith.constant 0 : i32
    return %arg0, %c0_i32 : i32, i32
  }
  func.func @transform_1(%arg0: i32) -> (i32, i32) {
    %c0_i32 = arith.constant 0 : i32
    %c0_i32_0 = arith.constant 0 : i32
    %c0_i32_1 = arith.constant 0 : i32
    return %c0_i32, %c0_i32_0 : i32, i32
  }
  func.func @transform_2(%arg0: i32) -> (i32, i32) {
    %c0_i32 = arith.constant 0 : i32
    %c0_i32_0 = arith.constant 0 : i32
    %c0_i32_1 = arith.constant 0 : i32
    return %c0_i32, %c0_i32_0 : i32, i32
  }
  func.func @transform_3(%arg0: i32) -> (i32, i32) {
    %c0_i32 = arith.constant 0 : i32
    %c0_i32_0 = arith.constant 0 : i32
    %c0_i32_1 = arith.constant 0 : i32
    return %c0_i32, %c0_i32_0 : i32, i32
  }
  func.func @transform_4(%arg0: i32) -> (i32, i32) {
    %c0_i32 = arith.constant 0 : i32
    %c0_i32_0 = arith.constant 0 : i32
    %c0_i32_1 = arith.constant 0 : i32
    return %c0_i32, %c0_i32_0 : i32, i32
  }
  func.func @transform_5(%arg0: i32) -> (i32, i32) {
    %c0_i32 = arith.constant 0 : i32
    %c0_i32_0 = arith.constant 0 : i32
    %c0_i32_1 = arith.constant 0 : i32
    return %c0_i32, %c0_i32_0 : i32, i32
  }
  func.func @transform_6(%arg0: i32) -> (i32, i32) {
    %c0_i32 = arith.constant 0 : i32
    %c0_i32_0 = arith.constant 0 : i32
    %c0_i32_1 = arith.constant 0 : i32
    return %c0_i32, %c0_i32_0 : i32, i32
  }
  func.func @transform_7(%arg0: i32) -> (i32, i32) {
    %c0_i32 = arith.constant 0 : i32
    %c0_i32_0 = arith.constant 0 : i32
    return %arg0, %c0_i32 : i32, i32
  }
}

</mosaic_0001>

<bundles_post_ra>
// kernel: customnet_forward.3
= control target key start
LH: loop header
LB: loop body
LE: loop exit
PB: predicated region body
PF: predicated region fallthrough
CT: control target
= control target key end

     0   :  { %s1085_s12 = smov 0   ;;  %s1087_s13 = smov 0   ;;  %s1278_s0 = inlined_call_operand.vmem [shape: bf16[4,80,512], index: 0, kind: input, shape index: {}]   ;;  %s1279_s1 = inlined_call_operand.vmem [shape: bf16[6,80], index: 1, kind: input, shape index: {}]   ;;  %s1280_s2 = inlined_call_operand.vmem [shape: f32[6,128], index: 2, kind: input, shape index: {}]   ;;  %s1281_s3 = inlined_call_operand.vmem [shape: bf16[6,512], index: 3, kind: output, shape index: {}]  }
   0x1   :  { %s1089_s14 = smov 0  }
   0x2 LB: > { %s864_s15 = sadd.s32 4294967295, %s1062_s14   ;;  %s1102_s16 = sadd.s32 1, %s1062_s14   ;;  %s1062_s14 = sphi %s1089_s14, %s1284_s14   ;;  %s1058_s13 = sphi %s1087_s13, %s1283_s13   ;;  %s1054_s12 = sphi %s1085_s12, %s1282_s12  }
   0x3   : > { %s17_s17 = ssub.s32 %s1062_s14, %s1102_s16  ;;  %s20_s18 = sadd.s32 1, %s1058_s13 }
   0x4   : > { %p18_p0 = scmp.eq.s32.totalorder %s17_s17, 0  ;;  %p27_p1 = scmp.ne.s32.totalorder %s1058_s13, %s1054_s12 }
   0x5   : > { %p28_p2 = scmp.eq.s32.totalorder %s1062_s14, 0  ;;  %p867_p4 = scmp.ge.s32.totalorder %s1062_s14, 2 }
   0x6   : > { %s1111_s19 = scalar_select %p18_p0, %s1058_s13, %s20_s18  }
   0x7   : > { %p29_p3 = por %p28_p2, %p27_p1  ;;  %127 = sbr.rel (%p867_p4) target bundleno = 38 (0x26), region = 24 }
   0xe   : > { %130 = sbr.rel (!%p29_p3) target bundleno = 38 (0x26), region = 28  ;;  %s132_s20 = sand.u32 (%p29_p3), 1, %s1058_s13  }
   0xf   : > { %s950_s21 = sshll.u32 (%p29_p3), %s1062_s14, 3  ;;  %s952_s22 = smul.u32 (%p29_p3), 320, %s132_s20 }
  0x10   : > { %s1119_s25 = scalar_lea.vmem (%p29_p3), %s1278_s0, %s950_s21 }
  0x11   : > { %v243_v0 = vld [vmem:[%s1119_s25] sm:$0xff] (%p29_p3)  ;;  %v245_v1 = vld [vmem:[%s1119_s25 + $0x10] sm:$0xff] (%p29_p3)  ;;  %s1127_s26 = scalar_lea.vmem (%p29_p3), [#allocation2], %s952_s22 }
  0x12   : > { %v247_v2 = vld [vmem:[%s1119_s25 + $0x20] sm:$0xff] (%p29_p3)  ;;  %v249_v3 = vld [vmem:[%s1119_s25 + $0x30] sm:$0xff] (%p29_p3)  ;;  %244 = vst [vmem:[%s1127_s26] sm:$0xff] (%p29_p3), %v243_v0  ;;  %246 = vst [vmem:[%s1127_s26 + $0x8] sm:$0xff] (%p29_p3), %v245_v1 }
  0x13   : > { %v251_v4 = vld [vmem:[%s1119_s25 + $0x40] sm:$0xff] (%p29_p3)  ;;  %v253_v5 = vld [vmem:[%s1119_s25 + $0x50] sm:$0xff] (%p29_p3)  ;;  %248 = vst [vmem:[%s1127_s26 + $0x10] sm:$0xff] (%p29_p3), %v247_v2  ;;  %250 = vst [vmem:[%s1127_s26 + $0x18] sm:$0xff] (%p29_p3), %v249_v3 }
  0x14   : > { %252 = vst [vmem:[%s1127_s26 + $0x20] sm:$0xff] (%p29_p3), %v251_v4  ;;  %254 = vst [vmem:[%s1127_s26 + $0x28] sm:$0xff] (%p29_p3), %v253_v5  ;;  %v255_v6 = vld [vmem:[%s1119_s25 + $0x60] sm:$0xff] (%p29_p3)  ;;  %v257_v7 = vld [vmem:[%s1119_s25 + $0x70] sm:$0xff] (%p29_p3) }
  0x15   : > { %v259_v8 = vld [vmem:[%s1119_s25 + $0x80] sm:$0xff]  ;;  %256 = vst [vmem:[%s1127_s26 + $0x30] sm:$0xff] %v255_v6  ;;  %258 = vst [vmem:[%s1127_s26 + $0x38] sm:$0xff] %v257_v7  ;;  %v261_v9 = vld [vmem:[%s1119_s25 + $0x90] sm:$0xff] }
  0x16   : > { %260 = vst [vmem:[%s1127_s26 + $0x40] sm:$0xff] %v259_v8  ;;  %v263_v10 = vld [vmem:[%s1119_s25 + $0xa0] sm:$0xff]  ;;  %v265_v11 = vld [vmem:[%s1119_s25 + $0xb0] sm:$0xff]  ;;  %262 = vst [vmem:[%s1127_s26 + $0x48] sm:$0xff] %v261_v9 }
  0x17   : > { %264 = vst [vmem:[%s1127_s26 + $0x50] sm:$0xff] %v263_v10  ;;  %266 = vst [vmem:[%s1127_s26 + $0x58] sm:$0xff] %v265_v11  ;;  %v267_v12 = vld [vmem:[%s1119_s25 + $0xc0] sm:$0xff]  ;;  %v269_v13 = vld [vmem:[%s1119_s25 + $0xd0] sm:$0xff] }
  0x18   : > { %v271_v14 = vld [vmem:[%s1119_s25 + $0xe0] sm:$0xff]  ;;  %268 = vst [vmem:[%s1127_s26 + $0x60] sm:$0xff] %v267_v12  ;;  %270 = vst [vmem:[%s1127_s26 + $0x68] sm:$0xff] %v269_v13  ;;  %v273_v15 = vld [vmem:[%s1119_s25 + $0xf0] sm:$0xff] }
  0x19   : > { %272 = vst [vmem:[%s1127_s26 + $0x70] sm:$0xff] %v271_v14  ;;  %v275_v16 = vld [vmem:[%s1119_s25 + $0x100] sm:$0xff]  ;;  %v277_v17 = vld [vmem:[%s1119_s25 + $0x110] sm:$0xff]  ;;  %274 = vst [vmem:[%s1127_s26 + $0x78] sm:$0xff] %v273_v15 }
  0x1a   : > { %276 = vst [vmem:[%s1127_s26 + $0x80] sm:$0xff] %v275_v16  ;;  %278 = vst [vmem:[%s1127_s26 + $0x88] sm:$0xff] %v277_v17  ;;  %v279_v18 = vld [vmem:[%s1119_s25 + $0x120] sm:$0xff]  ;;  %v281_v19 = vld [vmem:[%s1119_s25 + $0x130] sm:$0xff] }
  0x1b   : > { %v283_v20 = vld [vmem:[%s1119_s25 + $0x140] sm:$0xff]  ;;  %280 = vst [vmem:[%s1127_s26 + $0x90] sm:$0xff] %v279_v18  ;;  %282 = vst [vmem:[%s1127_s26 + $0x98] sm:$0xff] %v281_v19  ;;  %v285_v21 = vld [vmem:[%s1119_s25 + $0x150] sm:$0xff] }
  0x1c   : > { %284 = vst [vmem:[%s1127_s26 + $0xa0] sm:$0xff] %v283_v20  ;;  %v287_v22 = vld [vmem:[%s1119_s25 + $0x160] sm:$0xff]  ;;  %v289_v23 = vld [vmem:[%s1119_s25 + $0x170] sm:$0xff]  ;;  %286 = vst [vmem:[%s1127_s26 + $0xa8] sm:$0xff] %v285_v21 }
  0x1d   : > { %288 = vst [vmem:[%s1127_s26 + $0xb0] sm:$0xff] %v287_v22  ;;  %290 = vst [vmem:[%s1127_s26 + $0xb8] sm:$0xff] %v289_v23  ;;  %v291_v24 = vld [vmem:[%s1119_s25 + $0x180] sm:$0xff]  ;;  %v293_v25 = vld [vmem:[%s1119_s25 + $0x190] sm:$0xff] }
  0x1e   : > { %v295_v26 = vld [vmem:[%s1119_s25 + $0x1a0] sm:$0xff]  ;;  %292 = vst [vmem:[%s1127_s26 + $0xc0] sm:$0xff] %v291_v24  ;;  %294 = vst [vmem:[%s1127_s26 + $0xc8] sm:$0xff] %v293_v25  ;;  %v297_v27 = vld [vmem:[%s1119_s25 + $0x1b0] sm:$0xff] }
  0x1f   : > { %296 = vst [vmem:[%s1127_s26 + $0xd0] sm:$0xff] %v295_v26  ;;  %v299_v28 = vld [vmem:[%s1119_s25 + $0x1c0] sm:$0xff]  ;;  %v301_v29 = vld [vmem:[%s1119_s25 + $0x1d0] sm:$0xff]  ;;  %298 = vst [vmem:[%s1127_s26 + $0xd8] sm:$0xff] %v297_v27 }
  0x20   : > { %300 = vst [vmem:[%s1127_s26 + $0xe0] sm:$0xff] %v299_v28  ;;  %302 = vst [vmem:[%s1127_s26 + $0xe8] sm:$0xff] %v301_v29  ;;  %v303_v30 = vld [vmem:[%s1119_s25 + $0x1e0] sm:$0xff]  ;;  %v305_v31 = vld [vmem:[%s1119_s25 + $0x1f0] sm:$0xff] }
  0x21   : > { %v307_v32 = vld [vmem:[%s1119_s25 + $0x200] sm:$0xff]  ;;  %304 = vst [vmem:[%s1127_s26 + $0xf0] sm:$0xff] %v303_v30  ;;  %306 = vst [vmem:[%s1127_s26 + $0xf8] sm:$0xff] %v305_v31  ;;  %v309_v33 = vld [vmem:[%s1119_s25 + $0x210] sm:$0xff] }
  0x22   : > { %308 = vst [vmem:[%s1127_s26 + $0x100] sm:$0xff] %v307_v32  ;;  %v311_v34 = vld [vmem:[%s1119_s25 + $0x220] sm:$0xff]  ;;  %v313_v35 = vld [vmem:[%s1119_s25 + $0x230] sm:$0xff]  ;;  %310 = vst [vmem:[%s1127_s26 + $0x108] sm:$0xff] %v309_v33 }
  0x23   : > { %312 = vst [vmem:[%s1127_s26 + $0x110] sm:$0xff] %v311_v34  ;;  %314 = vst [vmem:[%s1127_s26 + $0x118] sm:$0xff] %v313_v35  ;;  %v315_v36 = vld [vmem:[%s1119_s25 + $0x240] sm:$0xff]  ;;  %v317_v37 = vld [vmem:[%s1119_s25 + $0x250] sm:$0xff] }
  0x24   : > { %v319_v38 = vld [vmem:[%s1119_s25 + $0x260] sm:$0xff]  ;;  %316 = vst [vmem:[%s1127_s26 + $0x120] sm:$0xff] %v315_v36  ;;  %318 = vst [vmem:[%s1127_s26 + $0x128] sm:$0xff] %v317_v37  ;;  %v321_v39 = vld [vmem:[%s1119_s25 + $0x270] sm:$0xff] }
  0x25   : > { %320 = vst [vmem:[%s1127_s26 + $0x130] sm:$0xff] %v319_v38  ;;  %322 = vst [vmem:[%s1127_s26 + $0x138] sm:$0xff] %v321_v39 }
  0x26 PF: > { %p870_p5 = scmp.ge.s32.totalorder %s1062_s14, 1  ;;  %p327_p6 = scmp.lt.s32.totalorder %s1062_s14, 3 }
  0x28   : > { %p328_p7 = pnand %p870_p5, %p327_p6 }
  0x29   : > { %s334_s27 = sand.u32 (!%p328_p7), 1, %s1054_s12   ;;  %v1064_v40 = vmov (!%p328_p7), 0   ;;  %v783_v41 = vld [vmem:[%s1280_s2] sm:$0x3f] (!%p328_p7)  ;;  %vm426_vm0 = vcmask (!%p328_p7), 654336   ;;  %s871_s7 = sshll.u32 (!%p328_p7), %s864_s15, 1 }
  0x2a   : > { %331 = sbr.rel (%p328_p7) target bundleno = 311 (0x137), region = 66  ;;  %462 = vmatprep.mubr.bf16.mxu0 (!%p328_p7), %v1064_v40  ;;  %564 = vmatprep.mubr.bf16.mxu1 (!%p328_p7), %v1064_v40  ;;  %v365_v0 = vld [vmem:[%s1279_s1] sm:$0x7] (!%p328_p7)  ;;  %p359_p8 = scmp.lt.s32.totalorder (!%p328_p7), %s871_s7, 3 }
  0x2b   : > { %s953_s28 = smul.u32 (!%p328_p7), 320, %s334_s27  ;;  %979 = vset.pattern.permute.xlu0 (!%p328_p7), %v1064_v40 }
  0x2c   : > { %786 = vperm.xlu0 (!%p328_p7), %979, %v783_v41  }
  0x2d   : > { %s1212_s4 = scalar_lea.vmem (!%p328_p7), [#allocation2], %s953_s28 }
  0x2e   : > { %v980_v42 = vld [vmem:[%s1212_s4 + $0x4] ss:$8 sps:$4 sm:$0xff] (!%p328_p7)   ;;  %v982_v43 = vld [vmem:[%s1212_s4 + $0x54] ss:$8 sps:$4 sm:$0xff] (!%p328_p7)   ;;  %v984_v44 = vld [vmem:[%s1212_s4] ss:$8 sps:$4 sm:$0xff] (!%p328_p7)  }
  0x2f   : > { %430 = vmatprep.subr.bf16.mxu0 (!%p328_p7), %v980_v42  ;;  %v985_v45 = vld [vmem:[%s1212_s4 + $0x50] ss:$8 sps:$4 sm:$0xff] (!%p328_p7)   ;;  %532 = vmatprep.subr.bf16.mxu1 (!%p328_p7), %v982_v43  ;;  %v986_v46 = vld [vmem:[%s1212_s4 + $0x14] ss:$8 sps:$4 sm:$0xff] (!%p328_p7)   ;;  %v988_v47 = vld [vmem:[%s1212_s4 + $0x64] ss:$8 sps:$4 sm:$0xff] (!%p328_p7)  }
  0x30   : > { %431 = vmatpush1.bf16.msra.mxu0 (!%p328_p7), %v984_v44  ;;  %533 = vmatpush1.bf16.msra.mxu1 (!%p328_p7), %v985_v45  ;;  %v990_v48 = vld [vmem:[%s1212_s4 + $0x10] ss:$8 sps:$4 sm:$0xff] (!%p328_p7)   ;;  %v991_v49 = vld [vmem:[%s1212_s4 + $0x60] ss:$8 sps:$4 sm:$0xff] (!%p328_p7)   ;;  %v992_v50 = vld [vmem:[%s1212_s4 + $0x24] ss:$8 sps:$4 sm:$0xff] (!%p328_p7)  }
  0x31   : > { %432 = vmatprep.subr.bf16.mxu0 %v986_v46  ;;  %534 = vmatprep.subr.bf16.mxu1 %v988_v47  ;;  %v994_v51 = vld [vmem:[%s1212_s4 + $0x74] ss:$8 sps:$4 sm:$0xff]   ;;  %v996_v52 = vld [vmem:[%s1212_s4 + $0x20] ss:$8 sps:$4 sm:$0xff]   ;;  %v997_v53 = vld [vmem:[%s1212_s4 + $0x70] ss:$8 sps:$4 sm:$0xff]  }
  0x32   : > { %v998_v54 = vld [vmem:[%s1212_s4 + $0x34] ss:$8 sps:$4 sm:$0xff]   ;;  %v1000_v55 = vld [vmem:[%s1212_s4 + $0x84] ss:$8 sps:$4 sm:$0xff]   ;;  %v1002_v56 = vld [vmem:[%s1212_s4 + $0x30] ss:$8 sps:$4 sm:$0xff]  }
  0x33   : > { %v1003_v57 = vld [vmem:[%s1212_s4 + $0x80] ss:$8 sps:$4 sm:$0xff]   ;;  %v1004_v58 = vld [vmem:[%s1212_s4 + $0x44] ss:$8 sps:$4 sm:$0xff]   ;;  %v1006_v59 = vld [vmem:[%s1212_s4 + $0x94] ss:$8 sps:$4 sm:$0xff]  }
  0x34   : > { %433 = vmatpush1.bf16.msra.mxu0 %v990_v48  ;;  %535 = vmatpush1.bf16.msra.mxu1 %v991_v49  ;;  %v1008_v60 = vld [vmem:[%s1212_s4 + $0x40] ss:$8 sps:$4 sm:$0xff]   ;;  %v1009_v61 = vld [vmem:[%s1212_s4 + $0x90] ss:$8 sps:$4 sm:$0xff]   ;;  %v1012_v62 = vld [vmem:[%s1212_s4 + $0xa4] ss:$8 sps:$4 sm:$0xff]  }
  0x35   : > { %434 = vmatprep.subr.bf16.mxu0 %v992_v50  ;;  %536 = vmatprep.subr.bf16.mxu1 %v994_v51  ;;  %v1015_v63 = vld [vmem:[%s1212_s4 + $0xf4] ss:$8 sps:$4 sm:$0xff]   ;;  %v1010_v1 = vld [vmem:[%s1212_s4 + $0xa0] ss:$8 sps:$4 sm:$0xff]   ;;  %v1013_v2 = vld [vmem:[%s1212_s4 + $0xf0] ss:$8 sps:$4 sm:$0xff]  }
  0x36   : > { %v1018_v3 = vld [vmem:[%s1212_s4 + $0xb4] ss:$8 sps:$4 sm:$0xff]   ;;  %v1021_v4 = vld [vmem:[%s1212_s4 + $0x104] ss:$8 sps:$4 sm:$0xff]   ;;  %v1016_v5 = vld [vmem:[%s1212_s4 + $0xb0] ss:$8 sps:$4 sm:$0xff]  }
  0x37   : > { %v1019_v6 = vld [vmem:[%s1212_s4 + $0x100] ss:$8 sps:$4 sm:$0xff]   ;;  %v1024_v7 = vld [vmem:[%s1212_s4 + $0xc4] ss:$8 sps:$4 sm:$0xff]   ;;  %v1027_v8 = vld [vmem:[%s1212_s4 + $0x114] ss:$8 sps:$4 sm:$0xff]  }
  0x38   : > { %435 = vmatpush1.bf16.msra.mxu0 %v996_v52  ;;  %537 = vmatpush1.bf16.msra.mxu1 %v997_v53  ;;  %v1022_v9 = vld [vmem:[%s1212_s4 + $0xc0] ss:$8 sps:$4 sm:$0xff]   ;;  %v1025_v10 = vld [vmem:[%s1212_s4 + $0x110] ss:$8 sps:$4 sm:$0xff]   ;;  %v1030_v11 = vld [vmem:[%s1212_s4 + $0xd4] ss:$8 sps:$4 sm:$0xff]  }
  0x39   : > { %436 = vmatprep.subr.bf16.mxu0 %v998_v54  ;;  %538 = vmatprep.subr.bf16.mxu1 %v1000_v55  ;;  %v1033_v12 = vld [vmem:[%s1212_s4 + $0x124] ss:$8 sps:$4 sm:$0xff]   ;;  %v1028_v13 = vld [vmem:[%s1212_s4 + $0xd0] ss:$8 sps:$4 sm:$0xff]   ;;  %v1031_v14 = vld [vmem:[%s1212_s4 + $0x120] ss:$8 sps:$4 sm:$0xff]  }
  0x3a   : > { %v1036_v15 = vld [vmem:[%s1212_s4 + $0xe4] ss:$8 sps:$4 sm:$0xff]   ;;  %v1039_v16 = vld [vmem:[%s1212_s4 + $0x134] ss:$8 sps:$4 sm:$0xff]   ;;  %v1034_v17 = vld [vmem:[%s1212_s4 + $0xe0] ss:$8 sps:$4 sm:$0xff]  }
  0x3b   : > { %v1037_v18 = vld [vmem:[%s1212_s4 + $0x130] ss:$8 sps:$4 sm:$0xff]   ;;  %s1286_s7 = smov (!%p359_p8, %s871_s7), 3 }
  0x3c   : > { %437 = vmatpush1.bf16.msra.mxu0 %v1002_v56  ;;  %539 = vmatpush1.bf16.msra.mxu1 %v1003_v57  ;;  %s872_s8 = sshll.u32 %s1286_s7, 2 }
  0x3d   : > { %438 = vmatprep.subr.bf16.mxu0 %v1004_v58  ;;  %540 = vmatprep.subr.bf16.mxu1 %v1006_v59  ;;  %s362_s11 = scalar_lea.vmem %s1281_s3, %s872_s8 }
  0x40   : > { %439 = vmatpush1.bf16.msra.mxu0 %v1008_v60  ;;  %541 = vmatpush1.bf16.msra.mxu1 %v1009_v61 }
  0x41   : > { %634 = vmatprep.subr.bf16.mxu0 %v1012_v62  ;;  %736 = vmatprep.subr.bf16.mxu1 %v1015_v63 }
  0x43   : > { %883 = vmatmul.mubr.msk.bf16.vlgmr.msra.gmra.mrb[0].mxu0 %vm426_vm0, %v365_v0  ;;  %904 = vmatmul.mubr.msk.bf16.vlgmr.msra.gmra.mrb[0].mxu1 %vm426_vm0, %v365_v0 }
  0x44   : > { %635 = vmatpush1.bf16.msra.mxu0 %v1010_v1  ;;  %737 = vmatpush1.bf16.msra.mxu1 %v1013_v2 }
  0x45   : > { %636 = vmatprep.subr.bf16.mxu0 %v1018_v3  ;;  %738 = vmatprep.subr.bf16.mxu1 %v1021_v4 }
  0x46   : > { %666 = vmatprep.mubr.bf16.mxu0 %v1064_v40  ;;  %768 = vmatprep.mubr.bf16.mxu1 %v1064_v40 }
  0x48   : > { %637 = vmatpush1.bf16.msra.mxu0 %v1016_v5  ;;  %739 = vmatpush1.bf16.msra.mxu1 %v1019_v6 }
  0x49   : > { %638 = vmatprep.subr.bf16.mxu0 %v1024_v7  ;;  %740 = vmatprep.subr.bf16.mxu1 %v1027_v8 }
  0x4c   : > { %639 = vmatpush1.bf16.msra.mxu0 %v1022_v9  ;;  %741 = vmatpush1.bf16.msra.mxu1 %v1025_v10 }
  0x4d   : > { %640 = vmatprep.subr.bf16.mxu0 %v1030_v11  ;;  %742 = vmatprep.subr.bf16.mxu1 %v1033_v12 }
  0x50   : > { %641 = vmatpush1.bf16.msra.mxu0 %v1028_v13  ;;  %743 = vmatpush1.bf16.msra.mxu1 %v1031_v14 }
  0x51   : > { %642 = vmatprep.subr.bf16.mxu0 %v1036_v15  ;;  %744 = vmatprep.subr.bf16.mxu1 %v1039_v16 }
  0x54   : > { %643 = vmatpush1.bf16.msra.mxu0 %v1034_v17  ;;  %745 = vmatpush1.bf16.msra.mxu1 %v1037_v18 }
  0x57   : > { %925 = vmatmul.mubr.msk.bf16.vlgmr.msra.gmra.mrb[4].mxu0 %vm426_vm0, %v365_v0  ;;  %946 = vmatmul.mubr.msk.bf16.vlgmr.msra.gmra.mrb[4].mxu1 %vm426_vm0, %v365_v0 }
  0xab   : > { %v787_v29 = vpop.permute.xlu0 %786 }
 0x116   : > { %v464_v19 = vpop.f32.mrb[0].mxu0  ;;  %v566_v20 = vpop.f32.mrb[0].mxu1 }
 0x117   : > { %v777_v21 = vmax.f32 %v464_v19, %v566_v20  ;;  %v466_v22 = vpop.f32.mrb[1].mxu0  ;;  %v568_v23 = vpop.f32.mrb[1].mxu1 }
 0x118   : > { %v778_v24 = vmax.f32 %v466_v22, %v568_v23  ;;  %v468_v25 = vpop.f32.mrb[2].mxu0  ;;  %v570_v26 = vpop.f32.mrb[2].mxu1 }
 0x119   : > { %v469_v27 = vpop.f32.mrb[3].mxu0  ;;  %v571_v28 = vpop.f32.mrb[3].mxu1 }
 0x12a   : > { %v668_v30 = vpop.f32.mrb[4].mxu0  ;;  %v770_v31 = vpop.f32.mrb[4].mxu1 }
 0x12b   : > { %v779_v32 = vmax.f32 %v668_v30, %v770_v31  ;;  %v670_v33 = vpop.f32.mrb[5].mxu0  ;;  %v772_v34 = vpop.f32.mrb[5].mxu1 }
 0x12c   : > { %v780_v35 = vmax.f32 %v670_v33, %v772_v34  ;;  %v672_v36 = vpop.f32.mrb[6].mxu0  ;;  %v774_v37 = vpop.f32.mrb[6].mxu1 }
 0x12d   : > { %v673_v38 = vpop.f32.mrb[7].mxu0  ;;  %v775_v39 = vpop.f32.mrb[7].mxu1  ;;  %v781_v40 = vmax.f32 %v777_v21, %v779_v32 }
 0x12e   : > { %v782_v41 = vmax.f32 %v778_v24, %v780_v35 }
 0x12f   : > { %v789_v42 = vadd.f32 %v787_v29, %v781_v40 }
 0x130   : > { %v790_v43 = vadd.f32 %v787_v29, %v782_v41 }
 0x131   : > { %v791_v44 = vmax.f32 %v789_v42, 0.0 }
 0x132   : > { %v792_v45 = vmax.f32 %v790_v43, 0.0 }
 0x134   : > { %v951_v46 = vpack.c.bf16 %v792_v45, %v791_v44 }
 0x136   : > { %801 = vst [vmem:[%s362_s11] sm:$0x77] %v951_v46 }
 0x137 PF: > { %p10_p9 = scmp.ge.s32.totalorder %s1102_s16, 4   ;;  %s1282_s12 = smov %s1058_s13 }
 0x138   : > { %s1283_s13 = smov %s1111_s19  ;;  %s1284_s14 = smov %s1102_s16 }
 0x139   :  { %12 = sbr.rel (!%p10_p9) target bundleno = 2 (0x2), region = 108 }

// kernel: customnet_forward.4
= control target key start
LH: loop header
LB: loop body
LE: loop exit
PB: predicated region body
PF: predicated region fallthrough
CT: control target
= control target key end

     0   :  { %v713_v0 = vmov 0   ;;  %vm106_vm0 = vcmask 261120   ;;  %s920_s0 = inlined_call_operand.vmem [shape: bf16[4,160,128], index: 0, kind: input, shape index: {}]   ;;  %s921_s1 = inlined_call_operand.vmem [shape: bf16[16,160], index: 1, kind: input, shape index: {}]   ;;  %s922_s2 = inlined_call_operand.vmem [shape: f32[16,128], index: 2, kind: input, shape index: {}]   ;;  %s923_s3 = inlined_call_operand.vmem [shape: bf16[16,128], index: 3, kind: output, shape index: {}]  }
   0x1   :  { %110 = vmatprep.subr.bf16.mxu0 %v713_v0  ;;  %232 = vmatprep.subr.bf16.mxu1 %v713_v0  ;;  %v670_v1 = vld [vmem:[%s920_s0] sm:$0xff]   ;;  %v671_v2 = vld [vmem:[%s920_s0 + $0x50] sm:$0xff]   ;;  %v672_v3 = vld [vmem:[%s920_s0 + $0x8] sm:$0xff]  }
   0x2   :  { %669 = vset.pattern.permute.xlu0 %v713_v0  ;;  %111 = vmatpush1.bf16.msra.mxu0 %v670_v1  ;;  %v673_v4 = vld [vmem:[%s920_s0 + $0x58] sm:$0xff]   ;;  %v674_v5 = vld [vmem:[%s920_s0 + $0x10] sm:$0xff]   ;;  %v675_v6 = vld [vmem:[%s920_s0 + $0x60] sm:$0xff]  }
   0x3   :  { %233 = vmatpush1.bf16.msra.mxu1 %v671_v2  ;;  %112 = vmatprep.subr.bf16.mxu0 %v713_v0  ;;  %v676_v7 = vld [vmem:[%s920_s0 + $0x18] sm:$0xff]   ;;  %v677_v8 = vld [vmem:[%s920_s0 + $0x68] sm:$0xff]   ;;  %v678_v9 = vld [vmem:[%s920_s0 + $0x20] sm:$0xff]  }
   0x4   :  { %234 = vmatprep.subr.bf16.mxu1 %v713_v0  ;;  %v679_v10 = vld [vmem:[%s920_s0 + $0x70] sm:$0xff]   ;;  %v680_v11 = vld [vmem:[%s920_s0 + $0x28] sm:$0xff]   ;;  %v681_v12 = vld [vmem:[%s920_s0 + $0x78] sm:$0xff]  }
   0x5   :  { %v690_v13 = vld [vmem:[%s921_s1 + $0x4] ss:$8 sps:$4 sm:$0xff]   ;;  %v682_v14 = vld [vmem:[%s920_s0 + $0x30] sm:$0xff]   ;;  %v684_v16 = vld [vmem:[%s920_s0 + $0x38] sm:$0xff]  }
   0x6   :  { %113 = vmatpush1.bf16.msra.mxu0 %v672_v3  ;;  %565 = vmatprep.mubr.msk.bf16.mxu0 %vm106_vm0, %v690_v13  ;;  %v683_v15 = vld [vmem:[%s920_s0 + $0x80] sm:$0xff]   ;;  %v685_v17 = vld [vmem:[%s920_s0 + $0x88] sm:$0xff]   ;;  %v687_v19 = vld [vmem:[%s920_s0 + $0x90] sm:$0xff]  }
   0x7   :  { %235 = vmatpush1.bf16.msra.mxu1 %v673_v4  ;;  %114 = vmatprep.subr.bf16.mxu0 %v713_v0  ;;  %v686_v18 = vld [vmem:[%s920_s0 + $0x40] sm:$0xff]   ;;  %v688_v20 = vld [vmem:[%s920_s0 + $0x48] sm:$0xff]   ;;  %v689_v21 = vld [vmem:[%s920_s0 + $0x98] sm:$0xff]  }
   0x8   :  { %236 = vmatprep.subr.bf16.mxu1 %v713_v0  ;;  %596 = vmatprep.mubr.msk.bf16.mxu1 %vm106_vm0, %v690_v13  ;;  %v823_v22 = vld [vmem:[%s921_s1] ss:$8 sps:$4 sm:$0xff]   ;;  %v694_v24 = vld [vmem:[%s920_s0 + $0xf0] sm:$0xff]   ;;  %v696_v27 = vld [vmem:[%s920_s0 + $0xf8] sm:$0xff]  }
   0x9   :  { %v693_v23 = vld [vmem:[%s920_s0 + $0xa0] sm:$0xff]   ;;  %v695_v25 = vld [vmem:[%s920_s0 + $0xa8] sm:$0xff]   ;;  %v697_v28 = vld [vmem:[%s920_s0 + $0xb0] sm:$0xff]  }
   0xa   :  { %115 = vmatpush1.bf16.msra.mxu0 %v674_v5  ;;  %v523_v26 = vld [vmem:[%s922_s2] sm:$0xff]  ;;  %v524_v29 = vld [vmem:[%s922_s2 + $0x8] sm:$0xff]  ;;  %v699_v31 = vld [vmem:[%s920_s0 + $0xb8] sm:$0xff]  }
   0xb   :  { %237 = vmatpush1.bf16.msra.mxu1 %v675_v6  ;;  %116 = vmatprep.subr.bf16.mxu0 %v713_v0  ;;  %v698_v30 = vld [vmem:[%s920_s0 + $0x100] sm:$0xff]   ;;  %v700_v32 = vld [vmem:[%s920_s0 + $0x108] sm:$0xff]   ;;  %v702_v34 = vld [vmem:[%s920_s0 + $0x110] sm:$0xff]  }
   0xc   :  { %238 = vmatprep.subr.bf16.mxu1 %v713_v0  ;;  %527 = vperm.xlu0 %669, %v523_v26   ;;  %v701_v33 = vld [vmem:[%s920_s0 + $0xc0] sm:$0xff]   ;;  %v703_v35 = vld [vmem:[%s920_s0 + $0xc8] sm:$0xff]   ;;  %v704_v36 = vld [vmem:[%s920_s0 + $0x118] sm:$0xff]  }
   0xd   :  { %v705_v37 = vld [vmem:[%s920_s0 + $0xd0] sm:$0xff]   ;;  %v706_v38 = vld [vmem:[%s920_s0 + $0x120] sm:$0xff]   ;;  %v707_v39 = vld [vmem:[%s920_s0 + $0xd8] sm:$0xff]  }
   0xe   :  { %117 = vmatpush1.bf16.msra.mxu0 %v676_v7  ;;  %v708_v40 = vld [vmem:[%s920_s0 + $0x128] sm:$0xff]   ;;  %v709_v41 = vld [vmem:[%s920_s0 + $0xe0] sm:$0xff]   ;;  %v710_v42 = vld [vmem:[%s920_s0 + $0x130] sm:$0xff]  }
   0xf   :  { %239 = vmatpush1.bf16.msra.mxu1 %v677_v8  ;;  %118 = vmatprep.subr.bf16.mxu0 %v713_v0  ;;  %v711_v43 = vld [vmem:[%s920_s0 + $0xe8] sm:$0xff]   ;;  %v712_v44 = vld [vmem:[%s920_s0 + $0x138] sm:$0xff]  }
  0x10   :  { %240 = vmatprep.subr.bf16.mxu1 %v713_v0  ;;  %532 = vperm.xlu0 %669, %v524_v29  }
  0x12   :  { %119 = vmatpush1.bf16.msra.mxu0 %v678_v9 }
  0x13   :  { %241 = vmatpush1.bf16.msra.mxu1 %v679_v10  ;;  %120 = vmatprep.subr.bf16.mxu0 %v713_v0 }
  0x14   :  { %242 = vmatprep.subr.bf16.mxu1 %v713_v0 }
  0x16   :  { %121 = vmatpush1.bf16.msra.mxu0 %v680_v11 }
  0x17   :  { %243 = vmatpush1.bf16.msra.mxu1 %v681_v12  ;;  %122 = vmatprep.subr.bf16.mxu0 %v713_v0 }
  0x18   :  { %244 = vmatprep.subr.bf16.mxu1 %v713_v0 }
  0x1a   :  { %123 = vmatpush1.bf16.msra.mxu0 %v682_v14 }
  0x1b   :  { %245 = vmatpush1.bf16.msra.mxu1 %v683_v15  ;;  %124 = vmatprep.subr.bf16.mxu0 %v713_v0 }
  0x1c   :  { %246 = vmatprep.subr.bf16.mxu1 %v713_v0 }
  0x1e   :  { %125 = vmatpush1.bf16.msra.mxu0 %v684_v16 }
  0x1f   :  { %247 = vmatpush1.bf16.msra.mxu1 %v685_v17  ;;  %126 = vmatprep.subr.bf16.mxu0 %v713_v0 }
  0x20   :  { %248 = vmatprep.subr.bf16.mxu1 %v713_v0 }
  0x22   :  { %127 = vmatpush1.bf16.msra.mxu0 %v686_v18 }
  0x23   :  { %249 = vmatpush1.bf16.msra.mxu1 %v687_v19  ;;  %128 = vmatprep.subr.bf16.mxu0 %v713_v0 }
  0x24   :  { %250 = vmatprep.subr.bf16.mxu1 %v713_v0 }
  0x26   :  { %129 = vmatpush1.bf16.msra.mxu0 %v688_v20 }
  0x27   :  { %251 = vmatpush1.bf16.msra.mxu1 %v689_v21  ;;  %354 = vmatprep.subr.bf16.mxu0 %v713_v0 }
  0x28   :  { %476 = vmatprep.subr.bf16.mxu1 %v713_v0 }
  0x29   :  { %143 = vmatmul.mubr.bf16.vlgmr.msra.gmra.mrb[0].mxu0 %v823_v22 }
  0x2a   :  { %265 = vmatmul.mubr.bf16.vlgmr.msra.gmra.mrb[0].mxu1 %v823_v22  ;;  %355 = vmatpush1.bf16.msra.mxu0 %v693_v23 }
  0x2b   :  { %477 = vmatpush1.bf16.msra.mxu1 %v694_v24  ;;  %356 = vmatprep.subr.bf16.mxu0 %v713_v0 }
  0x2c   :  { %478 = vmatprep.subr.bf16.mxu1 %v713_v0  ;;  %627 = vmatprep.mubr.msk.bf16.mxu0 %vm106_vm0, %v690_v13 }
  0x2d   :  { %658 = vmatprep.mubr.msk.bf16.mxu1 %vm106_vm0, %v690_v13 }
  0x2e   :  { %357 = vmatpush1.bf16.msra.mxu0 %v695_v25 }
  0x2f   :  { %479 = vmatpush1.bf16.msra.mxu1 %v696_v27  ;;  %358 = vmatprep.subr.bf16.mxu0 %v713_v0 }
  0x30   :  { %480 = vmatprep.subr.bf16.mxu1 %v713_v0 }
  0x32   :  { %359 = vmatpush1.bf16.msra.mxu0 %v697_v28 }
  0x33   :  { %481 = vmatpush1.bf16.msra.mxu1 %v698_v30  ;;  %360 = vmatprep.subr.bf16.mxu0 %v713_v0 }
  0x34   :  { %482 = vmatprep.subr.bf16.mxu1 %v713_v0 }
  0x36   :  { %361 = vmatpush1.bf16.msra.mxu0 %v699_v31 }
  0x37   :  { %483 = vmatpush1.bf16.msra.mxu1 %v700_v32  ;;  %362 = vmatprep.subr.bf16.mxu0 %v713_v0 }
  0x38   :  { %484 = vmatprep.subr.bf16.mxu1 %v713_v0 }
  0x3a   :  { %363 = vmatpush1.bf16.msra.mxu0 %v701_v33 }
  0x3b   :  { %485 = vmatpush1.bf16.msra.mxu1 %v702_v34  ;;  %364 = vmatprep.subr.bf16.mxu0 %v713_v0 }
  0x3c   :  { %486 = vmatprep.subr.bf16.mxu1 %v713_v0 }
  0x3e   :  { %365 = vmatpush1.bf16.msra.mxu0 %v703_v35 }
  0x3f   :  { %487 = vmatpush1.bf16.msra.mxu1 %v704_v36  ;;  %366 = vmatprep.subr.bf16.mxu0 %v713_v0 }
  0x40   :  { %488 = vmatprep.subr.bf16.mxu1 %v713_v0 }
  0x42   :  { %367 = vmatpush1.bf16.msra.mxu0 %v705_v37 }
  0x43   :  { %489 = vmatpush1.bf16.msra.mxu1 %v706_v38  ;;  %368 = vmatprep.subr.bf16.mxu0 %v713_v0 }
  0x44   :  { %490 = vmatprep.subr.bf16.mxu1 %v713_v0 }
  0x46   :  { %369 = vmatpush1.bf16.msra.mxu0 %v707_v39 }
  0x47   :  { %491 = vmatpush1.bf16.msra.mxu1 %v708_v40  ;;  %370 = vmatprep.subr.bf16.mxu0 %v713_v0 }
  0x48   :  { %492 = vmatprep.subr.bf16.mxu1 %v713_v0 }
  0x4a   :  { %371 = vmatpush1.bf16.msra.mxu0 %v709_v41 }
  0x4b   :  { %493 = vmatpush1.bf16.msra.mxu1 %v710_v42  ;;  %372 = vmatprep.subr.bf16.mxu0 %v713_v0 }
  0x4c   :  { %494 = vmatprep.subr.bf16.mxu1 %v713_v0 }
  0x4e   :  { %373 = vmatpush1.bf16.msra.mxu0 %v711_v43 }
  0x4f   :  { %495 = vmatpush1.bf16.msra.mxu1 %v712_v44 }
  0x51   :  { %387 = vmatmul.mubr.bf16.vlgmr.msra.gmra.mrb[4].mxu0 %v823_v22 }
  0x52   :  { %509 = vmatmul.mubr.bf16.vlgmr.msra.gmra.mrb[4].mxu1 %v823_v22 }
  0x8b   :  { %v528_v55 = vpop.permute.xlu0 %527 }
  0x8f   :  { %v533_v5 = vpop.permute.xlu0 %532 }
  0xfc   :  { %v144_v45 = vpop.f32.mrb[0].mxu0 }
  0xfd   :  { %v266_v46 = vpop.f32.mrb[0].mxu1  ;;  %v146_v47 = vpop.f32.mrb[1].mxu0 }
  0xfe   :  { %v517_v48 = vmax.f32 %v144_v45, %v266_v46  ;;  %v268_v49 = vpop.f32.mrb[1].mxu1  ;;  %v147_v50 = vpop.f32.mrb[2].mxu0 }
  0xff   :  { %v269_v51 = vpop.f32.mrb[2].mxu1  ;;  %v149_v52 = vpop.f32.mrb[3].mxu0 }
 0x100   :  { %v518_v53 = vmax.f32 %v147_v50, %v269_v51  ;;  %v271_v54 = vpop.f32.mrb[3].mxu1 }
 0x124   :  { %v388_v56 = vpop.f32.mrb[4].mxu0 }
 0x125   :  { %v510_v57 = vpop.f32.mrb[4].mxu1  ;;  %v390_v58 = vpop.f32.mrb[5].mxu0 }
 0x126   :  { %v519_v59 = vmax.f32 %v388_v56, %v510_v57  ;;  %v512_v60 = vpop.f32.mrb[5].mxu1  ;;  %v391_v61 = vpop.f32.mrb[6].mxu0 }
 0x127   :  { %v513_v62 = vpop.f32.mrb[6].mxu1  ;;  %v393_v63 = vpop.f32.mrb[7].mxu0 }
 0x128   :  { %v521_v0 = vmax.f32 %v517_v48, %v519_v59  ;;  %v520_v1 = vmax.f32 %v391_v61, %v513_v62  ;;  %v515_v2 = vpop.f32.mrb[7].mxu1 }
 0x12a   :  { %v535_v3 = vadd.f32 %v528_v55, %v521_v0  ;;  %v522_v4 = vmax.f32 %v518_v53, %v520_v1 }
 0x12c   :  { %v536_v6 = vadd.f32 %v533_v5, %v522_v4  ;;  %v537_v7 = vmax.f32 %v535_v3, 0.0 }
 0x12e   :  { %v538_v8 = vmax.f32 %v536_v6, 0.0 }
 0x130   :  { %v666_v9 = vpack.c.bf16 %v538_v8, %v537_v7 }
 0x132   :  { %667 = vst [vmem:[%s923_s3] sm:$0xff] %v666_v9  }

// kernel: customnet_forward.5
= control target key start
LH: loop header
LB: loop body
LE: loop exit
PB: predicated region body
PF: predicated region fallthrough
CT: control target
= control target key end

     0   :  { %v828_v39 = vmov 0.0   ;;  %vm829_vm0 = vmmov 0   ;;  %s1050_s1 = inlined_call_operand.vmem [shape: bf16[512,128], index: 1, kind: input, shape index: {}]   ;;  %s1051_s0 = inlined_call_operand.vmem [shape: bf16[8,512], index: 0, kind: input, shape index: {}]   ;;  %s1052_s3 = inlined_call_operand.vmem [shape: bf16[128,128], index: 3, kind: input, shape index: {}]   ;;  %s1053_s5 = inlined_call_operand.vmem [shape: bf16[128,128], index: 5, kind: input, shape index: {}]   ;;  %s1054_s2 = inlined_call_operand.vmem [shape: f32[1,128], index: 2, kind: input, shape index: {}]   ;;  %s1055_s4 = inlined_call_operand.vmem [shape: f32[1,128], index: 4, kind: input, shape index: {}]   ;;  %s1056_s6 = inlined_call_operand.vmem [shape: f32[1,128], index: 6, kind: input, shape index: {}]   ;;  %s1057_s7 = inlined_call_operand.vmem [shape: f32[8,128], index: 7, kind: output, shape index: {}]  }
   0x1   :  { %v776_v0 = vld [vmem:[%s1050_s1 + $0x40] sm:$0xff]   ;;  %v780_v4 = vld [vmem:[%s1050_s1 + $0x48] sm:$0xff]   ;;  %v784_v8 = vld [vmem:[%s1050_s1 + $0x50] sm:$0xff]  }
   0x2   :  { %v777_v1 = vld [vmem:[%s1050_s1 + $0xc0] sm:$0xff]   ;;  %672 = vmatprep.subr.bf16.mxu0 %v776_v0  ;;  %v781_v5 = vld [vmem:[%s1050_s1 + $0xc8] sm:$0xff]   ;;  %v785_v9 = vld [vmem:[%s1050_s1 + $0xd0] sm:$0xff]  }
   0x3   :  { %v778_v2 = vld [vmem:[%s1050_s1] sm:$0xff]   ;;  %694 = vmatprep.subr.bf16.mxu1 %v777_v1  ;;  %v782_v6 = vld [vmem:[%s1050_s1 + $0x8] sm:$0xff]   ;;  %v786_v10 = vld [vmem:[%s1050_s1 + $0x10] sm:$0xff]  }
   0x4   :  { %v779_v3 = vld [vmem:[%s1050_s1 + $0x80] sm:$0xff]   ;;  %673 = vmatpush3.bf16.msra.mxu0 %v778_v2  ;;  %v783_v7 = vld [vmem:[%s1050_s1 + $0x88] sm:$0xff]   ;;  %v787_v11 = vld [vmem:[%s1050_s1 + $0x90] sm:$0xff]  }
   0x5   :  { %695 = vmatpush3.bf16.msra.mxu1 %v779_v3  ;;  %674 = vmatprep.subr.bf16.mxu0 %v780_v4  ;;  %v788_v12 = vld [vmem:[%s1050_s1 + $0x58] sm:$0xff]   ;;  %v792_v16 = vld [vmem:[%s1050_s1 + $0x60] sm:$0xff]   ;;  %v796_v20 = vld [vmem:[%s1050_s1 + $0x68] sm:$0xff]  }
   0x6   :  { %696 = vmatprep.subr.bf16.mxu1 %v781_v5  ;;  %v789_v13 = vld [vmem:[%s1050_s1 + $0xd8] sm:$0xff]   ;;  %v793_v17 = vld [vmem:[%s1050_s1 + $0xe0] sm:$0xff]   ;;  %v797_v21 = vld [vmem:[%s1050_s1 + $0xe8] sm:$0xff]  }
   0x7   :  { %v790_v14 = vld [vmem:[%s1050_s1 + $0x18] sm:$0xff]   ;;  %v794_v18 = vld [vmem:[%s1050_s1 + $0x20] sm:$0xff]   ;;  %v798_v22 = vld [vmem:[%s1050_s1 + $0x28] sm:$0xff]  }
   0x8   :  { %675 = vmatpush3.bf16.msra.mxu0 %v782_v6  ;;  %v791_v15 = vld [vmem:[%s1050_s1 + $0x98] sm:$0xff]   ;;  %v795_v19 = vld [vmem:[%s1050_s1 + $0xa0] sm:$0xff]   ;;  %v799_v23 = vld [vmem:[%s1050_s1 + $0xa8] sm:$0xff]  }
   0x9   :  { %697 = vmatpush3.bf16.msra.mxu1 %v783_v7  ;;  %676 = vmatprep.subr.bf16.mxu0 %v784_v8  ;;  %v800_v24 = vld [vmem:[%s1050_s1 + $0x70] sm:$0xff]   ;;  %v804_v28 = vld [vmem:[%s1050_s1 + $0x78] sm:$0xff]   ;;  %v27_v32 = vld [vmem:[%s1051_s0] sm:$0xff] }
   0xa   :  { %698 = vmatprep.subr.bf16.mxu1 %v785_v9  ;;  %v801_v25 = vld [vmem:[%s1050_s1 + $0xf0] sm:$0xff]   ;;  %v805_v29 = vld [vmem:[%s1050_s1 + $0xf8] sm:$0xff]   ;;  %v28_v33 = vld [vmem:[%s1051_s0 + $0x8] sm:$0xff]  ;;  %v618_v34 = vcombine.low %v27_v32, %v27_v32  ;;  %v619_v35 = vcombine.high %v27_v32, %v27_v32 }
   0xb   :  { %v802_v26 = vld [vmem:[%s1050_s1 + $0x30] sm:$0xff]   ;;  %v806_v30 = vld [vmem:[%s1050_s1 + $0x38] sm:$0xff]   ;;  %v620_v36 = vcombine.low %v28_v33, %v28_v33  ;;  %v621_v37 = vcombine.high %v28_v33, %v28_v33  ;;  %v812_v38 = vld [vmem:[%s1052_s3] sm:$0xff]  }
   0xc   :  { %677 = vmatpush3.bf16.msra.mxu0 %v786_v10  ;;  %v803_v27 = vld [vmem:[%s1050_s1 + $0xb0] sm:$0xff]   ;;  %v807_v31 = vld [vmem:[%s1050_s1 + $0xb8] sm:$0xff]   ;;  %338 = vmatprep.mubr.bf16.mxu0 %v619_v35  ;;  %v813_v40 = vld [vmem:[%s1052_s3 + $0x8] sm:$0xff]  }
   0xd   :  { %699 = vmatpush3.bf16.msra.mxu1 %v787_v11  ;;  %678 = vmatprep.subr.bf16.mxu0 %v788_v12  ;;  %v814_v41 = vld [vmem:[%s1052_s3 + $0x10] sm:$0xff]   ;;  %v815_v42 = vld [vmem:[%s1052_s3 + $0x18] sm:$0xff]   ;;  %v816_v43 = vld [vmem:[%s1052_s3 + $0x20] sm:$0xff]  }
   0xe   :  { %700 = vmatprep.subr.bf16.mxu1 %v789_v13  ;;  %378 = vmatprep.mubr.bf16.mxu1 %v621_v37  ;;  %v817_v44 = vld [vmem:[%s1052_s3 + $0x28] sm:$0xff]   ;;  %v818_v45 = vld [vmem:[%s1052_s3 + $0x30] sm:$0xff]   ;;  %v819_v46 = vld [vmem:[%s1052_s3 + $0x38] sm:$0xff]  }
   0xf   :  { %v820_v47 = vld [vmem:[%s1053_s5] sm:$0xff]   ;;  %v821_v48 = vld [vmem:[%s1053_s5 + $0x8] sm:$0xff]   ;;  %v822_v49 = vld [vmem:[%s1053_s5 + $0x10] sm:$0xff]  }
  0x10   :  { %679 = vmatpush3.bf16.msra.mxu0 %v790_v14  ;;  %v823_v50 = vld [vmem:[%s1053_s5 + $0x18] sm:$0xff]   ;;  %v824_v51 = vld [vmem:[%s1053_s5 + $0x20] sm:$0xff]   ;;  %v825_v52 = vld [vmem:[%s1053_s5 + $0x28] sm:$0xff]  }
  0x11   :  { %701 = vmatpush3.bf16.msra.mxu1 %v791_v15  ;;  %680 = vmatprep.subr.bf16.mxu0 %v792_v16  ;;  %v617_v55 = vld [vmem:[%s1054_s2] ss:$0 sm:$0xff]  ;;  %v826_v4 = vld [vmem:[%s1053_s5 + $0x30] sm:$0xff]   ;;  %v827_v5 = vld [vmem:[%s1053_s5 + $0x38] sm:$0xff]  }
  0x12   :  { %702 = vmatprep.subr.bf16.mxu1 %v793_v17  ;;  %v654_v6 = vld [vmem:[%s1055_s4] ss:$0 sm:$0xff] }
  0x13   :  { %v663_v14 = vld [vmem:[%s1056_s6] ss:$0 sm:$0xff] }
  0x14   :  { %681 = vmatpush3.bf16.msra.mxu0 %v794_v18 }
  0x15   :  { %703 = vmatpush3.bf16.msra.mxu1 %v795_v19  ;;  %682 = vmatprep.subr.bf16.mxu0 %v796_v20 }
  0x16   :  { %704 = vmatprep.subr.bf16.mxu1 %v797_v21 }
  0x18   :  { %683 = vmatpush3.bf16.msra.mxu0 %v798_v22 }
  0x19   :  { %705 = vmatpush3.bf16.msra.mxu1 %v799_v23  ;;  %684 = vmatprep.subr.bf16.mxu0 %v800_v24 }
  0x1a   :  { %706 = vmatprep.subr.bf16.mxu1 %v801_v25 }
  0x1c   :  { %685 = vmatpush3.bf16.msra.mxu0 %v802_v26 }
  0x1d   :  { %707 = vmatpush3.bf16.msra.mxu1 %v803_v27  ;;  %686 = vmatprep.subr.bf16.mxu0 %v804_v28 }
  0x1e   :  { %708 = vmatprep.subr.bf16.mxu1 %v805_v29 }
  0x20   :  { %687 = vmatpush3.bf16.msra.mxu0 %v806_v30 }
  0x21   :  { %709 = vmatpush3.bf16.msra.mxu1 %v807_v31  ;;  %734 = vmatprep.subr.bf16.mxu0 %v828_v39 }
  0x22   :  { %754 = vmatprep.subr.bf16.mxu1 %v828_v39 }
  0x23   :  { %339 = vmatmul.mubr.bf16.vlgmr.msra.gmra.mrb[0].mxu0 %v618_v34 }
  0x24   :  { %379 = vmatmul.mubr.bf16.vlgmr.msra.gmra.mrb[0].mxu1 %v620_v36  ;;  %735 = vmatpush3.bf16.msra.mxu0 %v812_v38 }
  0x25   :  { %736 = vmatprep.subr.bf16.mxu0 %v828_v39  ;;  %750 = vmatprep.mubr.msk.bf16.mxu0 %vm829_vm0, %v828_v39 }
  0x26   :  { %770 = vmatprep.mubr.msk.bf16.mxu1 %vm829_vm0, %v828_v39  ;;  %755 = vmatpush3.bf16.msra.mxu1 %v820_v47 }
  0x27   :  { %756 = vmatprep.subr.bf16.mxu1 %v828_v39 }
  0x28   :  { %737 = vmatpush3.bf16.msra.mxu0 %v813_v40 }
  0x29   :  { %738 = vmatprep.subr.bf16.mxu0 %v828_v39 }
  0x2a   :  { %757 = vmatpush3.bf16.msra.mxu1 %v821_v48 }
  0x2b   :  { %758 = vmatprep.subr.bf16.mxu1 %v828_v39 }
  0x2c   :  { %739 = vmatpush3.bf16.msra.mxu0 %v814_v41 }
  0x2d   :  { %740 = vmatprep.subr.bf16.mxu0 %v828_v39 }
  0x2e   :  { %759 = vmatpush3.bf16.msra.mxu1 %v822_v49 }
  0x2f   :  { %760 = vmatprep.subr.bf16.mxu1 %v828_v39 }
  0x30   :  { %741 = vmatpush3.bf16.msra.mxu0 %v815_v42 }
  0x31   :  { %742 = vmatprep.subr.bf16.mxu0 %v828_v39 }
  0x32   :  { %761 = vmatpush3.bf16.msra.mxu1 %v823_v50 }
  0x33   :  { %762 = vmatprep.subr.bf16.mxu1 %v828_v39 }
  0x34   :  { %743 = vmatpush3.bf16.msra.mxu0 %v816_v43 }
  0x35   :  { %744 = vmatprep.subr.bf16.mxu0 %v828_v39 }
  0x36   :  { %763 = vmatpush3.bf16.msra.mxu1 %v824_v51 }
  0x37   :  { %764 = vmatprep.subr.bf16.mxu1 %v828_v39 }
  0x38   :  { %745 = vmatpush3.bf16.msra.mxu0 %v817_v44 }
  0x39   :  { %746 = vmatprep.subr.bf16.mxu0 %v828_v39 }
  0x3a   :  { %765 = vmatpush3.bf16.msra.mxu1 %v825_v52 }
  0x3b   :  { %766 = vmatprep.subr.bf16.mxu1 %v828_v39 }
  0x3c   :  { %747 = vmatpush3.bf16.msra.mxu0 %v818_v45 }
  0x3d   :  { %748 = vmatprep.subr.bf16.mxu0 %v828_v39 }
  0x3e   :  { %767 = vmatpush3.bf16.msra.mxu1 %v826_v4 }
  0x3f   :  { %768 = vmatprep.subr.bf16.mxu1 %v828_v39 }
  0x40   :  { %749 = vmatpush3.bf16.msra.mxu0 %v819_v46 }
  0x42   :  { %769 = vmatpush3.bf16.msra.mxu1 %v827_v5 }
  0xf6   :  { %v688_v53 = vpop.f32.mrb[0].mxu0 }
  0xf7   :  { %v710_v54 = vpop.f32.mrb[0].mxu1  ;;  %v689_v56 = vpop.f32.mrb[1].mxu0 }
  0xf8   :  { %v711_v57 = vpop.f32.mrb[1].mxu1  ;;  %v690_v58 = vadd.f32 %v689_v56, %v688_v53  ;;  %v691_v60 = vpop.f32.mrb[2].mxu0 }
  0xf9   :  { %v712_v59 = vadd.f32 %v711_v57, %v710_v54  ;;  %v713_v61 = vpop.f32.mrb[2].mxu1  ;;  %v692_v62 = vpop.f32.mrb[3].mxu0 }
  0xfa   :  { %v714_v63 = vpop.f32.mrb[3].mxu1  ;;  %v341_v0 = vadd.f32 %v690_v58, %v617_v55 }
  0xfc   :  { %v381_v1 = vadd.f32 %v712_v59, %v341_v0 }
  0xfe   :  { %v386_v2 = vmax.f32 %v381_v1, 0.0 }
 0x100   :  { %v387_v3 = vpack.c.bf16 %v386_v2, %v386_v2 }
 0x102   :  { %751 = vmatmul.mubr.bf16.vlgmr.msra.gmra.mrb[4].mxu0 %v387_v3 }
 0x1d5   :  { %v493_v7 = vpop.f32.mrb[4].mxu0 }
 0x1d6   :  { %v494_v8 = vadd.f32 %v654_v6, %v493_v7  ;;  %v752_v9 = vpop.f32.mrb[5].mxu0 }
 0x1d7   :  { %v496_v10 = vpop.f32.mrb[6].mxu0 }
 0x1d8   :  { %v499_v11 = vmax.f32 %v494_v8, 0.0  ;;  %v753_v12 = vpop.f32.mrb[7].mxu0 }
 0x1da   :  { %v500_v13 = vpack.c.bf16 %v499_v11, %v499_v11 }
 0x1dc   :  { %771 = vmatmul.mubr.bf16.vlgmr.msra.gmra.mrb[4].mxu1 %v500_v13 }
 0x2af   :  { %v606_v15 = vpop.f32.mrb[4].mxu1 }
 0x2b0   :  { %v607_v16 = vadd.f32 %v663_v14, %v606_v15  ;;  %v772_v17 = vpop.f32.mrb[5].mxu1 }
 0x2b1   :  { %v609_v18 = vpop.f32.mrb[6].mxu1 }
 0x2b2   :  { %612 = vst [vmem:[%s1057_s7] sm:$0xff] %v607_v16  ;;  %v773_v19 = vpop.f32.mrb[7].mxu1 }

</bundles_post_ra>
